<compile_context>
chip_gen: v7x
topology: tpu7x:2x2x1
jax: 0.10.0
libtpu: 0.0.40
codegen_flags: <defaults>
</compile_context>

<pallas_src>
import jax
import jax.numpy as jnp
from jax.experimental import pallas as pl
from jax.experimental.pallas import tpu as pltpu

LANE = 128
TM_MAX = 4096          # (4096,128) f32 tile = 2 MiB; double-buffered 4 MiB -> fits v5e/v6e/v7x
NCORES = 2             # leading "parallel" axis -> sharded across v7x TensorCores


def _make_kernel(TM, rows, grid_m, steps_per_core, needs_row_mask):
    def kernel(x_ref, o_ref):
        p = pl.program_id(0)            # core-parallel axis
        i = pl.program_id(1)            # sequential reduction axis
        block_idx = p * steps_per_core + i

        @pl.when(i == 0)
        def _init():
            o_ref[...] = jnp.zeros_like(o_ref)

        @pl.when(block_idx < grid_m)    # skip clamped/overshoot blocks entirely
        def _accum():
            tile = x_ref[...].astype(jnp.float32)                       # (TM, LANE)
            hinge = jnp.maximum(jnp.float32(0.0), jnp.float32(1.0) - tile)
            if needs_row_mask:          # static: only traced when a partial block exists
                local_rows = rows - block_idx * TM
                row_ids = jax.lax.broadcasted_iota(jnp.int32, (TM, LANE), 0)
                hinge = jnp.where(row_ids < local_rows, hinge, jnp.float32(0.0))
            # (TM,128) -> (TM//8, 8, 128); reduce over leading dim = pure VPU vreg adds.
            partial = jnp.sum(hinge.reshape(TM // 8, 8, LANE), axis=0)   # (8, LANE) f32
            o_ref[...] += partial[None]
    return kernel


@jax.jit
def custom_loss(x):
    """sum(max(0, 1 - x)) over all elements of x, as a scalar f32."""
    flat = x.reshape(-1)
    if not jnp.issubdtype(flat.dtype, jnp.floating):
        flat = flat.astype(jnp.float32)
    n = flat.shape[0]

    rows = pl.cdiv(n, LANE)
    pad = rows * LANE - n
    if pad > 0:
        # Rare (n % 128 != 0): pad only the sub-lane tail with 1.0 -> contributes 0.
        flat = jnp.pad(flat, (0, pad), constant_values=1.0)
    x2 = flat.reshape(rows, LANE)

    # Tile height: as large as possible, aligned to the dtype's sublane packing.
    sub = {4: 8, 2: 16, 1: 32}.get(x2.dtype.itemsize, 8)
    TM = min(TM_MAX, ((rows + sub - 1) // sub) * sub)
    grid_m = pl.cdiv(rows, TM)
    steps_per_core = pl.cdiv(grid_m, NCORES)
    needs_row_mask = (rows % TM) != 0          # last real block is partial in rows

    kernel = _make_kernel(TM, rows, grid_m, steps_per_core, needs_row_mask)

    partials = pl.pallas_call(
        kernel,
        out_shape=jax.ShapeDtypeStruct((NCORES, 8, LANE), jnp.float32),
        grid_spec=pltpu.PrefetchScalarGridSpec(
            num_scalar_prefetch=0,
            grid=(NCORES, steps_per_core),
            in_specs=[pl.BlockSpec(
                (TM, LANE),
                # clamp overshoot block indices so the auto-DMA never goes OOB;
                # their (re-read) data is skipped via pl.when in the kernel.
                lambda p, i: (jnp.minimum(p * steps_per_core + i, grid_m - 1), 0),
            )],
            out_specs=pl.BlockSpec((1, 8, LANE), lambda p, i: (p, 0, 0)),
        ),
        compiler_params=pltpu.CompilerParams(
            dimension_semantics=("parallel", "arbitrary"),
        ),
    )(x2)

    # Single tiny final reduction (NCORES*8*128 elems) outside the hot loop.
    return jnp.sum(partials)


if __name__ == "__main__":
    key = jax.random.PRNGKey(0)
    x = jax.random.normal(key, (2, 4, 16, 16), dtype=jnp.float32)

    loss = custom_loss(x)
    jax.block_until_ready(loss)
    ref = jnp.sum(jnp.maximum(0.0, 1.0 - x))
    assert jnp.allclose(loss, ref, rtol=1e-5, atol=1e-5), (loss, ref)

    # Second check: misaligned element count exercises the partial-block / row-mask path.
    key2, _ = jax.random.split(key)
    y = jax.random.normal(key2, (3, 5, 7, 11), dtype=jnp.float32)
    loss2 = custom_loss(y)
    jax.block_until_ready(loss2)
    ref2 = jnp.sum(jnp.maximum(0.0, 1.0 - y))
    assert jnp.allclose(loss2, ref2, rtol=1e-5, atol=1e-5), (loss2, ref2)

    print("KERNEL_OK")
</pallas_src>

<mosaic_0001>
module attributes {stable_mosaic.version = 11 : i64} {
  func.func @kernel(%arg0: i32, %arg1: i32, %arg2: memref<16x128xf32, #tpu.memory_space<vmem>>, %arg3: memref<1x8x128xf32, #tpu.memory_space<vmem>>) attributes {dimension_semantics = [#tpu.dimension_semantics<parallel>, #tpu.dimension_semantics<arbitrary>], iteration_bounds = array<i64: 2, 1>, scalar_prefetch = 0 : i64, scratch_operands = 0 : i64, tpu.core_type = #tpu.core_type<tc>, window_params = [{transform_indices = @transform_0, window_bounds = array<i64: 16, 128>}, {transform_indices = @transform_1, window_bounds = array<i64: 1, 8, 128>}]} {
    %c1_i32 = arith.constant 1 : i32
    %0 = arith.muli %arg0, %c1_i32 : i32
    %1 = arith.addi %0, %arg1 : i32
    %c0_i32 = arith.constant 0 : i32
    %2 = arith.cmpi eq, %arg1, %c0_i32 : i32
    %3 = arith.extui %2 : i1 to i32
    %c0_i32_0 = arith.constant 0 : i32
    %4 = arith.cmpi ne, %3, %c0_i32_0 : i32
    scf.if %4 {
      %cst = arith.constant 0.000000e+00 : f32
      %8 = vector.broadcast %cst : f32 to vector<1x8x128xf32>
      %c0 = arith.constant 0 : index
      %c0_3 = arith.constant 0 : index
      %c0_4 = arith.constant 0 : index
      %9 = vector.load %arg3[%c0, %c0_3, %c0_4] : memref<1x8x128xf32, #tpu.memory_space<vmem>>, vector<1x8x128xf32>
      tpu.vector_store %arg3[%c0, %c0_3, %c0_4], %8 {strides = array<i32>} : memref<1x8x128xf32, #tpu.memory_space<vmem>>, vector<1x8x128xf32>,
    } else {
    }
    %c1_i32_1 = arith.constant 1 : i32
    %5 = arith.cmpi slt, %1, %c1_i32_1 : i32
    %6 = arith.extui %5 : i1 to i32
    %c0_i32_2 = arith.constant 0 : i32
    %7 = arith.cmpi ne, %6, %c0_i32_2 : i32
    scf.if %7 {
      %c0 = arith.constant 0 : index
      %c0_3 = arith.constant 0 : index
      %8 = vector.load %arg2[%c0, %c0_3] : memref<16x128xf32, #tpu.memory_space<vmem>>, vector<16x128xf32>
      %cst = arith.constant 1.000000e+00 : f32
      %9 = vector.broadcast %cst : f32 to vector<16x128xf32>
      %10 = arith.subf %9, %8 : vector<16x128xf32>
      %cst_4 = arith.constant 0.000000e+00 : f32
      %11 = vector.broadcast %cst_4 : f32 to vector<16x128xf32>
      %12 = arith.maximumf %11, %10 : vector<16x128xf32>
      %13 = vector.shape_cast %12 : vector<16x128xf32> to vector<2x8x128xf32>
      %cst_5 = arith.constant dense<0.000000e+00> : vector<8x128xf32>
      %14 = vector.multi_reduction <add>, %13, %cst_5 [0] : vector<2x8x128xf32> to vector<8x128xf32>
      %c0_6 = arith.constant 0 : index
      %c0_7 = arith.constant 0 : index
      %c0_8 = arith.constant 0 : index
      %15 = vector.load %arg3[%c0_6, %c0_7, %c0_8] : memref<1x8x128xf32, #tpu.memory_space<vmem>>, vector<1x8x128xf32>
      %16 = vector.shape_cast %14 : vector<8x128xf32> to vector<1x8x128xf32>
      %17 = arith.addf %15, %16 : vector<1x8x128xf32>
      %c0_9 = arith.constant 0 : index
      %c0_10 = arith.constant 0 : index
      %c0_11 = arith.constant 0 : index
      %18 = vector.load %arg3[%c0_9, %c0_10, %c0_11] : memref<1x8x128xf32, #tpu.memory_space<vmem>>, vector<1x8x128xf32>
      tpu.vector_store %arg3[%c0_9, %c0_10, %c0_11], %17 {strides = array<i32>} : memref<1x8x128xf32, #tpu.memory_space<vmem>>, vector<1x8x128xf32>,
    } else {
    }
    return
  }
  func.func @transform_0(%arg0: i32, %arg1: i32) -> (i32, i32) {
    %c1_i32 = arith.constant 1 : i32
    %0 = arith.muli %arg0, %c1_i32 : i32
    %1 = arith.addi %0, %arg1 : i32
    %c0_i32 = arith.constant 0 : i32
    %2 = arith.minsi %1, %c0_i32 : i32
    %c0_i32_0 = arith.constant 0 : i32
    %c0_i32_1 = arith.constant 0 : i32
    return %2, %c0_i32_0 : i32, i32
  }
  func.func @transform_1(%arg0: i32, %arg1: i32) -> (i32, i32, i32) {
    %c0_i32 = arith.constant 0 : i32
    %c0_i32_0 = arith.constant 0 : i32
    %c0_i32_1 = arith.constant 0 : i32
    return %arg0, %c0_i32, %c0_i32_0 : i32, i32, i32
  }
}

</mosaic_0001>

<bundles_post_ra>
// kernel: custom_loss.1
= control target key start
LH: loop header
LB: loop body
LE: loop exit
PB: predicated region body
PF: predicated region fallthrough
CT: control target
= control target key end

     0   :  { %s302_s6 = smov 0   ;;  %s304_s7 = smov 0   ;;  %s335_s0 = inlined_call_operand.vmem [shape: f32[16,128], index: 0, kind: input, shape index: {}]   ;;  %s336_s1 = inlined_call_operand.vmem [shape: f32[2,8,128], index: 1, kind: output, shape index: {}]  }
   0x1   :  { %s306_s8 = smov 0  }
   0x2 LB: > { %s23_s9 = sadd.s32 1, %s285_s7  ;;  %p235_p0 = scmp.ge.s32.totalorder %s289_s8, 1  ;;  %s289_s8 = sphi %s306_s8, %s11_s8   ;;  %s285_s7 = sphi %s304_s7, %s338_s7   ;;  %s281_s6 = sphi %s302_s6, %s337_s6  }
   0x3   : > { %p25_p1 = scmp.ge.s32.totalorder %s23_s9, 2  ;;  %p112_p2 = scmp.lt.s32.totalorder %s289_s8, 3 }
   0x5   : > { %s340_s9 = smov (%p25_p1, %s23_s9), 0  ;;  %p113_p3 = pnand %p235_p0, %p112_p2 }
   0x6   : > { %p135_p4 = scmp.lt.s32.totalorder (!%p113_p3), %s281_s6, 0  ;;  %p146_p5 = scmp.lt.s32.totalorder (!%p113_p3), %s281_s6, 1  ;;  %v291_v0 = vmov (!%p113_p3), 0.0  }
   0x7   : > { %116 = sbr.rel (%p113_p3) target bundleno = 32 (0x20), region = 24  ;;  %p239_p7 = scmp.ge.s32.totalorder (!%p113_p3), %s281_s6, 1 }
   0xe   : > { %s136_s10 = scalar_select %p135_p4, %s281_s6, 0 }
   0xf   : > { %s147_s11 = scalar_select %p146_p5, %s281_s6, 1 }
  0x10   : > { %s236_s12 = sshll.u32 %s136_s10, 1  ;;  %159 = sbr.rel (%p239_p7) target bundleno = 32 (0x20), region = 32 }
  0x11   : > { %p138_p6 = scmp.lt.s32.totalorder %s236_s12, 1  ;;  %s238_s13 = sshll.u32 %s147_s11, 3 }
  0x12   : > { %s149_s16 = scalar_lea.vmem %s336_s1, %s238_s13 }
  0x13   : > { %s342_s12 = smov (!%p138_p6, %s236_s12), 1  ;;  %155 = vst [vmem:[%s149_s16] sm:$0xff] %v291_v0 }
  0x14   : > { %s237_s17 = sshll.u32 %s342_s12, 3 }
  0x15   : > { %s141_s20 = scalar_lea.vmem %s335_s0, %s237_s17 }
  0x16   : > { %v160_v1 = vld [vmem:[%s141_s20] sm:$0xff] (!%p239_p7)  ;;  %v161_v2 = vld [vmem:[%s141_s20 + $0x8] sm:$0xff] (!%p239_p7) }
  0x17   : > { %v162_v3 = vsub.f32 1.0, %v160_v1  ;;  %v163_v4 = vsub.f32 1.0, %v161_v2 }
  0x19   : > { %v164_v5 = vmax.f32 %v162_v3, 0.0  ;;  %v165_v6 = vmax.f32 %v163_v4, 0.0 }
  0x1a   : > { %v167_v7 = vld [vmem:[%s149_s16] sm:$0xff] }
  0x1b   : > { %v166_v8 = vadd.f32 %v165_v6, %v164_v5 }
  0x1d   : > { %v168_v9 = vadd.f32 %v167_v7, %v166_v8 }
  0x1f   : > { %169 = vst [vmem:[%s149_s16] sm:$0xff] %v168_v9 }
  0x20 PF: > { %s11_s8 = sadd.s32 1, %s289_s8   ;;  %s337_s6 = smov %s285_s7 }
  0x21   : > { %p8_p8 = scmp.ge.s32.totalorder %s11_s8, 4   ;;  %s338_s7 = smov %s340_s9 }
  0x23   :  { %10 = sbr.rel (!%p8_p8) target bundleno = 2 (0x2), region = 62 }

</bundles_post_ra>
